<compile_context>
chip_gen: v6e
topology: v6e:2x2x1
jax: 0.10.0
libtpu: 0.0.40
codegen_flags: <defaults>
</compile_context>

<pallas_src>
import functools

import jax
import jax.numpy as jnp
from jax.experimental import pallas as pl
from jax.experimental.pallas import tpu as pltpu


def _round_up(x, m):
    return ((x + m - 1) // m) * m


# ---------------------------------------------------------------------------
# Pallas kernel:  out = act(A2 @ HW2 + Hself), relation reduction fused into K.
# ---------------------------------------------------------------------------
def _rgcn_agg_kernel(a_ref, hw_ref, hself_ref, o_ref, *, relu):
    """grid = (row_tiles, k_tiles); K = fused (relation x source-node) axis.

    The f32 output block is resident across the K axis and doubles as the
    accumulator (no extra VMEM scratch).  NOTE: hself's index_map ignores k,
    so its block is also resident across k; it is read ONLY at k == 0 --
    do not read it at k > 0 expecting fresh data.
    """
    k = pl.program_id(1)

    @pl.when(k == 0)
    def _init():
        # self-loop term H @ W_self initializes the accumulator
        o_ref[...] = hself_ref[...]

    # message + aggregate chunk:  A2[row_tile, k_tile] @ HW2[k_tile, :]
    o_ref[...] += jnp.dot(
        a_ref[...], hw_ref[...], preferred_element_type=jnp.float32
    )

    if relu:
        @pl.when(k == pl.num_programs(1) - 1)
        def _act():
            o_ref[...] = jnp.maximum(o_ref[...], 0.0)


def rgcn_aggregate(a2, hw2, hself, *, relu, tm, tk):
    """Compute act(a2 @ hw2 + hself).  All operands pre-padded / pre-cast.

    a2:    (n_rows, K) bf16   relation-fused adjacency (dst-major), K = R*n_k
    hw2:   (K, fout_p) bf16   relation-stacked H @ W_r
    hself: (n_rows, fout_p) f32
    """
    n_rows, K = a2.shape
    fout_p = hw2.shape[1]
    assert n_rows % tm == 0 and K % tk == 0

    grid = (n_rows // tm, K // tk)

    # Double-buffered input blocks + resident output block; decoupled from N.
    vmem_need = (
        2 * (tm * tk * 2 + tk * fout_p * 2 + tm * fout_p * 4)
        + 2 * tm * fout_p * 4
    )
    vmem_limit = int(min(48 * 1024 * 1024, max(16 * 1024 * 1024, 2 * vmem_need)))

    kernel = functools.partial(_rgcn_agg_kernel, relu=relu)

    return pl.pallas_call(
        kernel,
        out_shape=jax.ShapeDtypeStruct((n_rows, fout_p), jnp.float32),
        grid_spec=pltpu.PrefetchScalarGridSpec(
            num_scalar_prefetch=0,
            grid=grid,
            in_specs=[
                pl.BlockSpec((tm, tk), lambda i, k: (i, k)),        # A2 tile
                pl.BlockSpec((tk, fout_p), lambda i, k: (k, 0)),    # HW2 tile
                pl.BlockSpec((tm, fout_p), lambda i, k: (i, 0)),    # self term
            ],
            out_specs=pl.BlockSpec((tm, fout_p), lambda i, k: (i, 0)),
        ),
        compiler_params=pltpu.CompilerParams(
            dimension_semantics=("parallel", "arbitrary"),
            vmem_limit_bytes=vmem_limit,
        ),
        cost_estimate=pl.CostEstimate(
            flops=2 * n_rows * K * fout_p,
            transcendentals=0,
            bytes_accessed=(
                n_rows * K * 2                            # A2 (bf16), streamed once
                + (n_rows // tm) * K * fout_p * 2         # HW2 re-stream per row tile
                + n_rows * fout_p * 4                     # hself (f32)
                + n_rows * fout_p * 4                     # out (f32)
            ),
        ),
    )(a2, hw2, hself)


def _choose_tiles(n, num_rels, *, row_tile=1024, k_tile=2048):
    """Pick (tm, n_rows, n_k, tk) for destination-row and contraction tiling."""
    # destination-node (row) tiling; ensure >= 2 tiles for v7x megacore when
    # the graph has enough rows to split.
    if n <= 256:
        tm = _round_up(n, 8)
    elif n < 2 * row_tile:
        tm = _round_up((n + 1) // 2, 8)
    else:
        tm = row_tile
    n_rows = _round_up(n, tm)

    # source-node padding (lane-dense K) and K tiling; K = num_rels * n_k.
    n_k = _round_up(n, 128)
    K = num_rels * n_k
    if K <= k_tile:
        tk = K
    else:
        tk = 128
        for cand in (k_tile, k_tile // 2, 1024, 512, 256):
            if K % cand == 0:
                tk = cand
                break
    return tm, n_rows, n_k, tk


def base_rgcn_forward(adj, params, *, row_tile=1024, k_tile=2048):
    """BaseRGCN.forward: featureless input (H^0 = I_N), layers in sequence."""
    num_rels, n, _ = adj.shape
    num_layers = len(params)

    tm, n_rows, n_k, tk = _choose_tiles(n, num_rels, row_tile=row_tile, k_tile=k_tile)
    K = num_rels * n_k

    # One-time adjacency re-layout (layer-invariant, hoisted out of the layer
    # loop): (R, N, N) f32 -> bf16, zero-pad, dst-major relation-fused 2-D.
    a2 = adj.astype(jnp.bfloat16)
    a2 = jnp.pad(a2, ((0, 0), (0, n_rows - n), (0, n_k - n)))
    a2 = jnp.transpose(a2, (1, 0, 2)).reshape(n_rows, K)

    h = None      # padded (n_rows, fprev_p) f32; logical block is [:n, :fin]
    fout = None
    for idx, (bases, coef, w_self) in enumerate(params):
        fin = w_self.shape[0]
        fout = w_self.shape[1]
        fout_p = _round_up(fout, 128)
        w = jnp.einsum("rb,bio->rio", coef, bases)            # (R, fin, fout)

        if h is None:
            # i2h with one-hot node ids:  I @ W_r = W_r,  I @ W_self = W_self
            hw = jnp.pad(w, ((0, 0), (0, n_k - fin), (0, fout_p - fout)))
            hw = hw.astype(jnp.bfloat16)
            hself = jnp.pad(
                w_self, ((0, n_rows - fin), (0, fout_p - fout))
            ).astype(jnp.float32)
        else:
            fprev_p = h.shape[1]
            # Pad the small per-layer weights (not the big padded h); padded
            # columns of h are zero so the extra weight rows never contribute.
            w_p = jnp.pad(w, ((0, 0), (0, fprev_p - fin), (0, fout_p - fout)))
            ws_p = jnp.pad(w_self, ((0, fprev_p - fin), (0, fout_p - fout)))
            if n_rows >= n_k:
                h_src = h[:n_k]
            else:
                h_src = jnp.pad(h, ((0, n_k - n_rows), (0, 0)))
            # Feature transform hoisted out of the tiled aggregation; bf16 MXU
            # inputs, f32 accumulate, emitted directly bf16 & already padded.
            hw = jnp.einsum(
                "nf,rfo->rno",
                h_src.astype(jnp.bfloat16),
                w_p.astype(jnp.bfloat16),
                preferred_element_type=jnp.float32,
            ).astype(jnp.bfloat16)
            hself = jnp.dot(h, ws_p, preferred_element_type=jnp.float32)

        hw2 = hw.reshape(K, fout_p)
        relu = idx < num_layers - 1          # i2h / h2h use ReLU, h2o is linear
        h = rgcn_aggregate(a2, hw2, hself, relu=relu, tm=tm, tk=tk)

    # TODO(synk): DGL EntityClassify applies softmax on the output layer; omitted
    # here so the output layer stays linear (logits), consistent with returning 'h'.
    return h[:n, :fout]


# ---------------------------------------------------------------------------
# Test harness
# ---------------------------------------------------------------------------
def _make_params(key, in_dim, out_dim, num_rels, num_bases):
    k1, k2, k3 = jax.random.split(key, 3)
    bases = jax.random.normal(k1, (num_bases, in_dim, out_dim), jnp.float32) * 0.1
    coef = jax.random.normal(k2, (num_rels, num_bases), jnp.float32) * 0.1
    w_self = jax.random.normal(k3, (in_dim, out_dim), jnp.float32) * 0.1
    return bases, coef, w_self


def _reference_forward(adj, params):
    n = adj.shape[1]
    h = jnp.eye(n, dtype=jnp.float32)
    num_layers = len(params)
    for idx, (bases, coef, w_self) in enumerate(params):
        w = jnp.einsum("rb,bio->rio", coef, bases)
        out = h @ w_self + jnp.einsum("rnm,mf,rfo->no", adj, h, w)
        if idx < num_layers - 1:
            out = jnp.maximum(out, 0.0)
        h = out
    return h


def _run_case(key, *, num_nodes, h_dim, out_dim, num_rels, num_bases,
              num_hidden_layers, p_edge=0.15):
    k_adj, *k_layers = jax.random.split(key, 1 + num_hidden_layers + 2)

    # Random per-relation adjacency, normalized by in-degree (c_{i,r}).
    raw = jax.random.bernoulli(
        k_adj, p=p_edge, shape=(num_rels, num_nodes, num_nodes)
    ).astype(jnp.float32)
    deg = jnp.sum(raw, axis=2, keepdims=True)
    adj = raw / jnp.maximum(deg, 1.0)          # (R, N, N), row-normalized

    dims = ([(num_nodes, h_dim)]
            + [(h_dim, h_dim)] * num_hidden_layers
            + [(h_dim, out_dim)])
    params = [
        _make_params(k, fi, fo, num_rels, num_bases)
        for k, (fi, fo) in zip(k_layers, dims)
    ]

    out = jax.jit(base_rgcn_forward)(adj, params)
    out = jax.block_until_ready(out)

    ref = _reference_forward(adj, params)
    assert out.shape == (num_nodes, out_dim)
    # bf16 MXU inputs with f32 accumulation: slightly looser tolerance than f32.
    assert jnp.allclose(out, ref, atol=2e-2, rtol=2e-2), "mismatch vs reference"


if __name__ == "__main__":
    root = jax.random.PRNGKey(0)
    k_small, k_med = jax.random.split(root)

    # Small config consistent with BaseRGCN.__init__ defaults.
    _run_case(k_small, num_nodes=32, h_dim=32, out_dim=16,
              num_rels=4, num_bases=2, num_hidden_layers=1)

    # Medium / ragged config exercising multi-row-tile + padding paths.
    _run_case(k_med, num_nodes=300, h_dim=24, out_dim=10,
              num_rels=3, num_bases=2, num_hidden_layers=1, p_edge=0.05)

    print("KERNEL_OK")
</pallas_src>

<mosaic_0001>
module attributes {stable_mosaic.version = 11 : i64} {
  func.func @_rgcn_agg_kernel(%arg0: i32, %arg1: i32, %arg2: memref<32x512xbf16, #tpu.memory_space<vmem>>, %arg3: memref<512x128xbf16, #tpu.memory_space<vmem>>, %arg4: memref<32x128xf32, #tpu.memory_space<vmem>>, %arg5: memref<32x128xf32, #tpu.memory_space<vmem>>) attributes {dimension_semantics = [#tpu.dimension_semantics<parallel>, #tpu.dimension_semantics<arbitrary>], iteration_bounds = array<i64: 1, 1>, scalar_prefetch = 0 : i64, scratch_operands = 0 : i64, tpu.core_type = #tpu.core_type<tc>, window_params = [{transform_indices = @transform_0, window_bounds = array<i64: 32, 512>}, {transform_indices = @transform_1, window_bounds = array<i64: 512, 128>}, {transform_indices = @transform_2, window_bounds = array<i64: 32, 128>}, {transform_indices = @transform_3, window_bounds = array<i64: 32, 128>}]} {
    %c0_i32 = arith.constant 0 : i32
    %0 = arith.cmpi eq, %arg1, %c0_i32 : i32
    %1 = arith.extui %0 : i1 to i32
    %c0_i32_0 = arith.constant 0 : i32
    %2 = arith.cmpi ne, %1, %c0_i32_0 : i32
    scf.if %2 {
      %c0_10 = arith.constant 0 : index
      %c0_11 = arith.constant 0 : index
      %12 = vector.load %arg4[%c0_10, %c0_11] : memref<32x128xf32, #tpu.memory_space<vmem>>, vector<32x128xf32>
      %c0_12 = arith.constant 0 : index
      %c0_13 = arith.constant 0 : index
      %13 = vector.load %arg5[%c0_12, %c0_13] : memref<32x128xf32, #tpu.memory_space<vmem>>, vector<32x128xf32>
      tpu.vector_store %arg5[%c0_12, %c0_13], %12 {strides = array<i32>} : memref<32x128xf32, #tpu.memory_space<vmem>>, vector<32x128xf32>,
    } else {
    }
    %c0 = arith.constant 0 : index
    %c0_1 = arith.constant 0 : index
    %3 = vector.load %arg5[%c0, %c0_1] : memref<32x128xf32, #tpu.memory_space<vmem>>, vector<32x128xf32>
    %c0_2 = arith.constant 0 : index
    %c0_3 = arith.constant 0 : index
    %4 = vector.load %arg2[%c0_2, %c0_3] : memref<32x512xbf16, #tpu.memory_space<vmem>>, vector<32x512xbf16>
    %c0_4 = arith.constant 0 : index
    %c0_5 = arith.constant 0 : index
    %5 = vector.load %arg3[%c0_4, %c0_5] : memref<512x128xbf16, #tpu.memory_space<vmem>>, vector<512x128xbf16>
    %cst = arith.constant dense<0.000000e+00> : vector<32x128xf32>
    %6 = tpu.matmul %4, %5, %cst {dimension_numbers = #tpu.dot_dimension_numbers<[1], [0], [0], [1], [0, 0, 1, 1], [], []>} : vector<32x512xbf16>, vector<512x128xbf16>, vector<32x128xf32> -> vector<32x128xf32>
    %7 = arith.addf %3, %6 : vector<32x128xf32>
    %c0_6 = arith.constant 0 : index
    %c0_7 = arith.constant 0 : index
    %8 = vector.load %arg5[%c0_6, %c0_7] : memref<32x128xf32, #tpu.memory_space<vmem>>, vector<32x128xf32>
    tpu.vector_store %arg5[%c0_6, %c0_7], %7 {strides = array<i32>} : memref<32x128xf32, #tpu.memory_space<vmem>>, vector<32x128xf32>,
    %c0_i32_8 = arith.constant 0 : i32
    %9 = arith.cmpi eq, %arg1, %c0_i32_8 : i32
    %10 = arith.extui %9 : i1 to i32
    %c0_i32_9 = arith.constant 0 : i32
    %11 = arith.cmpi ne, %10, %c0_i32_9 : i32
    scf.if %11 {
      %c0_10 = arith.constant 0 : index
      %c0_11 = arith.constant 0 : index
      %12 = vector.load %arg5[%c0_10, %c0_11] : memref<32x128xf32, #tpu.memory_space<vmem>>, vector<32x128xf32>
      %cst_12 = arith.constant 0.000000e+00 : f32
      %13 = vector.broadcast %cst_12 : f32 to vector<32x128xf32>
      %14 = arith.maximumf %12, %13 : vector<32x128xf32>
      %c0_13 = arith.constant 0 : index
      %c0_14 = arith.constant 0 : index
      %15 = vector.load %arg5[%c0_13, %c0_14] : memref<32x128xf32, #tpu.memory_space<vmem>>, vector<32x128xf32>
      tpu.vector_store %arg5[%c0_13, %c0_14], %14 {strides = array<i32>} : memref<32x128xf32, #tpu.memory_space<vmem>>, vector<32x128xf32>,
    } else {
    }
    return
  }
  func.func @transform_0(%arg0: i32, %arg1: i32) -> (i32, i32) {
    %c0_i32 = arith.constant 0 : i32
    return %arg0, %arg1 : i32, i32
  }
  func.func @transform_1(%arg0: i32, %arg1: i32) -> (i32, i32) {
    %c0_i32 = arith.constant 0 : i32
    %c0_i32_0 = arith.constant 0 : i32
    return %arg1, %c0_i32 : i32, i32
  }
  func.func @transform_2(%arg0: i32, %arg1: i32) -> (i32, i32) {
    %c0_i32 = arith.constant 0 : i32
    %c0_i32_0 = arith.constant 0 : i32
    return %arg0, %c0_i32 : i32, i32
  }
  func.func @transform_3(%arg0: i32, %arg1: i32) -> (i32, i32) {
    %c0_i32 = arith.constant 0 : i32
    %c0_i32_0 = arith.constant 0 : i32
    return %arg0, %c0_i32 : i32, i32
  }
}

module attributes {stable_mosaic.version = 11 : i64} {
  func.func @_rgcn_agg_kernel(%arg0: i32, %arg1: i32, %arg2: memref<32x512xbf16, #tpu.memory_space<vmem>>, %arg3: memref<512x128xbf16, #tpu.memory_space<vmem>>, %arg4: memref<32x128xf32, #tpu.memory_space<vmem>>, %arg5: memref<32x128xf32, #tpu.memory_space<vmem>>) attributes {dimension_semantics = [#tpu.dimension_semantics<parallel>, #tpu.dimension_semantics<arbitrary>], iteration_bounds = array<i64: 1, 1>, scalar_prefetch = 0 : i64, scratch_operands = 0 : i64, tpu.core_type = #tpu.core_type<tc>, window_params = [{transform_indices = @transform_0, window_bounds = array<i64: 32, 512>}, {transform_indices = @transform_1, window_bounds = array<i64: 512, 128>}, {transform_indices = @transform_2, window_bounds = array<i64: 32, 128>}, {transform_indices = @transform_3, window_bounds = array<i64: 32, 128>}]} {
    %c0_i32 = arith.constant 0 : i32
    %0 = arith.cmpi eq, %arg1, %c0_i32 : i32
    %1 = arith.extui %0 : i1 to i32
    %c0_i32_0 = arith.constant 0 : i32
    %2 = arith.cmpi ne, %1, %c0_i32_0 : i32
    scf.if %2 {
      %c0_8 = arith.constant 0 : index
      %c0_9 = arith.constant 0 : index
      %9 = vector.load %arg4[%c0_8, %c0_9] : memref<32x128xf32, #tpu.memory_space<vmem>>, vector<32x128xf32>
      %c0_10 = arith.constant 0 : index
      %c0_11 = arith.constant 0 : index
      %10 = vector.load %arg5[%c0_10, %c0_11] : memref<32x128xf32, #tpu.memory_space<vmem>>, vector<32x128xf32>
      tpu.vector_store %arg5[%c0_10, %c0_11], %9 {strides = array<i32>} : memref<32x128xf32, #tpu.memory_space<vmem>>, vector<32x128xf32>,
    } else {
    }
    %c0 = arith.constant 0 : index
    %c0_1 = arith.constant 0 : index
    %3 = vector.load %arg5[%c0, %c0_1] : memref<32x128xf32, #tpu.memory_space<vmem>>, vector<32x128xf32>
    %c0_2 = arith.constant 0 : index
    %c0_3 = arith.constant 0 : index
    %4 = vector.load %arg2[%c0_2, %c0_3] : memref<32x512xbf16, #tpu.memory_space<vmem>>, vector<32x512xbf16>
    %c0_4 = arith.constant 0 : index
    %c0_5 = arith.constant 0 : index
    %5 = vector.load %arg3[%c0_4, %c0_5] : memref<512x128xbf16, #tpu.memory_space<vmem>>, vector<512x128xbf16>
    %cst = arith.constant dense<0.000000e+00> : vector<32x128xf32>
    %6 = tpu.matmul %4, %5, %cst {dimension_numbers = #tpu.dot_dimension_numbers<[1], [0], [0], [1], [0, 0, 1, 1], [], []>} : vector<32x512xbf16>, vector<512x128xbf16>, vector<32x128xf32> -> vector<32x128xf32>
    %7 = arith.addf %3, %6 : vector<32x128xf32>
    %c0_6 = arith.constant 0 : index
    %c0_7 = arith.constant 0 : index
    %8 = vector.load %arg5[%c0_6, %c0_7] : memref<32x128xf32, #tpu.memory_space<vmem>>, vector<32x128xf32>
    tpu.vector_store %arg5[%c0_6, %c0_7], %7 {strides = array<i32>} : memref<32x128xf32, #tpu.memory_space<vmem>>, vector<32x128xf32>,
    return
  }
  func.func @transform_0(%arg0: i32, %arg1: i32) -> (i32, i32) {
    %c0_i32 = arith.constant 0 : i32
    return %arg0, %arg1 : i32, i32
  }
  func.func @transform_1(%arg0: i32, %arg1: i32) -> (i32, i32) {
    %c0_i32 = arith.constant 0 : i32
    %c0_i32_0 = arith.constant 0 : i32
    return %arg1, %c0_i32 : i32, i32
  }
  func.func @transform_2(%arg0: i32, %arg1: i32) -> (i32, i32) {
    %c0_i32 = arith.constant 0 : i32
    %c0_i32_0 = arith.constant 0 : i32
    return %arg0, %c0_i32 : i32, i32
  }
  func.func @transform_3(%arg0: i32, %arg1: i32) -> (i32, i32) {
    %c0_i32 = arith.constant 0 : i32
    %c0_i32_0 = arith.constant 0 : i32
    return %arg0, %c0_i32 : i32, i32
  }
}

</mosaic_0001>

<bundles_post_ra>
// kernel: base_rgcn_forward.3
= control target key start
LH: loop header
LB: loop body
LE: loop exit
PB: predicated region body
PF: predicated region fallthrough
CT: control target
= control target key end

     0   :  { %s764_s1 = inlined_call_operand.vmem [shape: bf16[512,128], index: 1, kind: input, shape index: {}]   ;;  %s765_s0 = inlined_call_operand.vmem [shape: bf16[32,512], index: 0, kind: input, shape index: {}]   ;;  %s766_s2 = inlined_call_operand.vmem [shape: f32[32,128], index: 2, kind: input, shape index: {}]   ;;  %s767_s3 = inlined_call_operand.vmem [shape: f32[32,128], index: 3, kind: output, shape index: {}]  }
   0x1   :  { %v556_v0 = vld [vmem:[%s764_s1 + $0x78] sm:$0xff]   ;;  %v560_v4 = vld [vmem:[%s764_s1 + $0x70] sm:$0xff]   ;;  %v564_v8 = vld [vmem:[%s764_s1 + $0x68] sm:$0xff]  }
   0x2   :  { %v557_v1 = vld [vmem:[%s764_s1 + $0xf8] sm:$0xff]   ;;  %500 = vmatprep.subr.bf16.mxu0 %v556_v0  ;;  %v561_v5 = vld [vmem:[%s764_s1 + $0xf0] sm:$0xff]   ;;  %v565_v9 = vld [vmem:[%s764_s1 + $0xe8] sm:$0xff]  }
   0x3   :  { %v558_v2 = vld [vmem:[%s764_s1 + $0x38] sm:$0xff]   ;;  %528 = vmatprep.subr.bf16.mxu1 %v557_v1  ;;  %v562_v6 = vld [vmem:[%s764_s1 + $0x30] sm:$0xff]   ;;  %v566_v10 = vld [vmem:[%s764_s1 + $0x28] sm:$0xff]  }
   0x4   :  { %v559_v3 = vld [vmem:[%s764_s1 + $0xb8] sm:$0xff]   ;;  %501 = vmatpush3.bf16.msra.mxu0 %v558_v2  ;;  %v563_v7 = vld [vmem:[%s764_s1 + $0xb0] sm:$0xff]   ;;  %v567_v11 = vld [vmem:[%s764_s1 + $0xa8] sm:$0xff]  }
   0x5   :  { %529 = vmatpush3.bf16.msra.mxu1 %v559_v3  ;;  %502 = vmatprep.subr.bf16.mxu0 %v560_v4  ;;  %v568_v12 = vld [vmem:[%s764_s1 + $0x60] sm:$0xff]   ;;  %v572_v16 = vld [vmem:[%s764_s1 + $0x58] sm:$0xff]   ;;  %v576_v20 = vld [vmem:[%s764_s1 + $0x50] sm:$0xff]  }
   0x6   :  { %530 = vmatprep.subr.bf16.mxu1 %v561_v5  ;;  %v569_v13 = vld [vmem:[%s764_s1 + $0xe0] sm:$0xff]   ;;  %v573_v17 = vld [vmem:[%s764_s1 + $0xd8] sm:$0xff]   ;;  %v577_v21 = vld [vmem:[%s764_s1 + $0xd0] sm:$0xff]  }
   0x7   :  { %v570_v14 = vld [vmem:[%s764_s1 + $0x20] sm:$0xff]   ;;  %v574_v18 = vld [vmem:[%s764_s1 + $0x18] sm:$0xff]   ;;  %v578_v22 = vld [vmem:[%s764_s1 + $0x10] sm:$0xff]  }
   0x8   :  { %503 = vmatpush3.bf16.msra.mxu0 %v562_v6  ;;  %v571_v15 = vld [vmem:[%s764_s1 + $0xa0] sm:$0xff]   ;;  %v575_v19 = vld [vmem:[%s764_s1 + $0x98] sm:$0xff]   ;;  %v579_v23 = vld [vmem:[%s764_s1 + $0x90] sm:$0xff]  }
   0x9   :  { %531 = vmatpush3.bf16.msra.mxu1 %v563_v7  ;;  %504 = vmatprep.subr.bf16.mxu0 %v564_v8  ;;  %v580_v24 = vld [vmem:[%s764_s1 + $0x48] sm:$0xff]   ;;  %v584_v28 = vld [vmem:[%s764_s1 + $0x40] sm:$0xff]   ;;  %v21_v2 = vld [vmem:[%s766_s2 + $0x10] sm:$0xff] }
   0xa   :  { %532 = vmatprep.subr.bf16.mxu1 %v565_v9  ;;  %v581_v25 = vld [vmem:[%s764_s1 + $0xc8] sm:$0xff]   ;;  %v585_v29 = vld [vmem:[%s764_s1 + $0xc0] sm:$0xff]  }
   0xb   :  { %v582_v26 = vld [vmem:[%s764_s1 + $0x8] sm:$0xff]   ;;  %v586_v30 = vld [vmem:[%s764_s1] sm:$0xff]  }
   0xc   :  { %505 = vmatpush3.bf16.msra.mxu0 %v566_v10  ;;  %v583_v27 = vld [vmem:[%s764_s1 + $0x88] sm:$0xff]   ;;  %v587_v31 = vld [vmem:[%s764_s1 + $0x80] sm:$0xff]  }
   0xd   :  { %533 = vmatpush3.bf16.msra.mxu1 %v567_v11  ;;  %506 = vmatprep.subr.bf16.mxu0 %v568_v12  ;;  %v588_v32 = vld [vmem:[%s765_s0] ss:$16 sps:$4 sm:$0xff]   ;;  %v590_v33 = vld [vmem:[%s765_s0 + $0x4] ss:$16 sps:$4 sm:$0xff]   ;;  %v591_v34 = vld [vmem:[%s765_s0 + $0x8] ss:$16 sps:$4 sm:$0xff]  }
   0xe   :  { %534 = vmatprep.subr.bf16.mxu1 %v569_v13  ;;  %v593_v35 = vld [vmem:[%s765_s0 + $0xc] ss:$16 sps:$4 sm:$0xff]   ;;  %367 = vmatprep.mubr.bf16.mxu0 %v590_v33  ;;  %v594_v36 = vld [vmem:[%s765_s0 + $0x24] ss:$16 sps:$4 sm:$0xff]   ;;  %v598_v38 = vld [vmem:[%s765_s0 + $0x20] ss:$16 sps:$4 sm:$0xff]  }
   0xf   :  { %416 = vmatprep.mubr.bf16.mxu1 %v593_v35  ;;  %v596_v37 = vld [vmem:[%s765_s0 + $0x2c] ss:$16 sps:$4 sm:$0xff]   ;;  %v599_v39 = vld [vmem:[%s765_s0 + $0x28] ss:$16 sps:$4 sm:$0xff]   ;;  %v19_v47 = vld [vmem:[%s766_s2] sm:$0xff] }
  0x10   :  { %507 = vmatpush3.bf16.msra.mxu0 %v570_v14  ;;  %v20_v56 = vld [vmem:[%s766_s2 + $0x8] sm:$0xff]  ;;  %v22_v11 = vld [vmem:[%s766_s2 + $0x18] sm:$0xff] }
  0x11   :  { %535 = vmatpush3.bf16.msra.mxu1 %v571_v15  ;;  %508 = vmatprep.subr.bf16.mxu0 %v572_v16 }
  0x12   :  { %536 = vmatprep.subr.bf16.mxu1 %v573_v17 }
  0x14   :  { %509 = vmatpush3.bf16.msra.mxu0 %v574_v18 }
  0x15   :  { %537 = vmatpush3.bf16.msra.mxu1 %v575_v19  ;;  %510 = vmatprep.subr.bf16.mxu0 %v576_v20 }
  0x16   :  { %538 = vmatprep.subr.bf16.mxu1 %v577_v21 }
  0x18   :  { %511 = vmatpush3.bf16.msra.mxu0 %v578_v22 }
  0x19   :  { %539 = vmatpush3.bf16.msra.mxu1 %v579_v23  ;;  %512 = vmatprep.subr.bf16.mxu0 %v580_v24 }
  0x1a   :  { %540 = vmatprep.subr.bf16.mxu1 %v581_v25 }
  0x1c   :  { %513 = vmatpush3.bf16.msra.mxu0 %v582_v26 }
  0x1d   :  { %541 = vmatpush3.bf16.msra.mxu1 %v583_v27  ;;  %514 = vmatprep.subr.bf16.mxu0 %v584_v28 }
  0x1e   :  { %542 = vmatprep.subr.bf16.mxu1 %v585_v29 }
  0x20   :  { %515 = vmatpush3.bf16.msra.mxu0 %v586_v30 }
  0x21   :  { %543 = vmatpush3.bf16.msra.mxu1 %v587_v31 }
  0x23   :  { %368 = vmatmul.mubr.bf16.vlgmr.msra.gmra.mxu0 %v588_v32 }
  0x24   :  { %417 = vmatmul.mubr.bf16.vlgmr.msra.gmra.mxu1 %v591_v34  ;;  %375 = vmatprep.mubr.bf16.mxu0 %v594_v36 }
  0x25   :  { %424 = vmatprep.mubr.bf16.mxu1 %v596_v37 }
  0x2b   :  { %376 = vmatmul.mubr.bf16.gmra.mxu0 %v598_v38 }
  0x2c   :  { %425 = vmatmul.mubr.bf16.gmra.mxu1 %v599_v39 }
  0xe3   :  { %v516_v40 = vpop.f32.mrf.mxu0 }
  0xe4   :  { %v544_v41 = vpop.f32.mrf.mxu1 }
  0xe5   :  { %v517_v42 = vpop.f32.mrf.mxu0 }
  0xe6   :  { %v518_v43 = vadd.f32 %v517_v42, %v516_v40  ;;  %v545_v44 = vpop.f32.mrf.mxu1 }
  0xe7   :  { %v546_v45 = vadd.f32 %v545_v44, %v544_v41  ;;  %v519_v46 = vpop.f32.mrf.mxu0 }
  0xe8   :  { %v547_v48 = vpop.f32.mrf.mxu1 }
  0xe9   :  { %v419_v49 = vadd.f32 %v546_v45, %v518_v43  ;;  %v520_v50 = vpop.f32.mrf.mxu0 }
  0xea   :  { %v521_v51 = vadd.f32 %v520_v50, %v519_v46  ;;  %v548_v52 = vpop.f32.mrf.mxu1 }
  0xeb   :  { %v433_v53 = vadd.f32 %v419_v49, %v19_v47  ;;  %v549_v54 = vadd.f32 %v548_v52, %v547_v48  ;;  %v522_v55 = vpop.f32.mrf.mxu0 }
  0xec   :  { %v550_v57 = vpop.f32.mrf.mxu1 }
  0xed   :  { %v448_v58 = vmax.f32 %v433_v53, 0.0  ;;  %v422_v59 = vadd.f32 %v549_v54, %v521_v51  ;;  %v523_v60 = vpop.f32.mrf.mxu0 }
  0xee   :  { %v524_v61 = vadd.f32 %v523_v60, %v522_v55  ;;  %v551_v62 = vpop.f32.mrf.mxu1 }
  0xef   :  { %452 = vst [vmem:[%s767_s3] sm:$0xff] %v448_v58  ;;  %v434_v63 = vadd.f32 %v422_v59, %v20_v56  ;;  %v552_v0 = vadd.f32 %v551_v62, %v550_v57  ;;  %v525_v1 = vpop.f32.mrf.mxu0 }
  0xf0   :  { %v553_v3 = vpop.f32.mrf.mxu1 }
  0xf1   :  { %v449_v4 = vmax.f32 %v434_v63, 0.0  ;;  %v427_v5 = vadd.f32 %v552_v0, %v524_v61  ;;  %v526_v6 = vpop.f32.mrf.mxu0 }
  0xf2   :  { %v527_v7 = vadd.f32 %v526_v6, %v525_v1  ;;  %v554_v8 = vpop.f32.mrf.mxu1 }
  0xf3   :  { %453 = vst [vmem:[%s767_s3 + $0x8] sm:$0xff] %v449_v4  ;;  %v435_v9 = vadd.f32 %v427_v5, %v21_v2  ;;  %v555_v10 = vadd.f32 %v554_v8, %v553_v3 }
  0xf5   :  { %v450_v12 = vmax.f32 %v435_v9, 0.0  ;;  %v430_v13 = vadd.f32 %v555_v10, %v527_v7 }
  0xf7   :  { %454 = vst [vmem:[%s767_s3 + $0x10] sm:$0xff] %v450_v12  ;;  %v436_v14 = vadd.f32 %v430_v13, %v22_v11 }
  0xf9   :  { %v451_v15 = vmax.f32 %v436_v14, 0.0 }
  0xfb   :  { %455 = vst [vmem:[%s767_s3 + $0x18] sm:$0xff] %v451_v15 }

// kernel: base_rgcn_forward.5
= control target key start
LH: loop header
LB: loop body
LE: loop exit
PB: predicated region body
PF: predicated region fallthrough
CT: control target
= control target key end

     0   :  { %s749_s1 = inlined_call_operand.vmem [shape: bf16[512,128], index: 1, kind: input, shape index: {}]   ;;  %s750_s0 = inlined_call_operand.vmem [shape: bf16[32,512], index: 0, kind: input, shape index: {}]   ;;  %s751_s2 = inlined_call_operand.vmem [shape: f32[32,128], index: 2, kind: input, shape index: {}]   ;;  %s752_s3 = inlined_call_operand.vmem [shape: f32[32,128], index: 3, kind: output, shape index: {}]  }
   0x1   :  { %v541_v0 = vld [vmem:[%s749_s1 + $0x78] sm:$0xff]   ;;  %v545_v4 = vld [vmem:[%s749_s1 + $0x70] sm:$0xff]   ;;  %v549_v8 = vld [vmem:[%s749_s1 + $0x68] sm:$0xff]  }
   0x2   :  { %v542_v1 = vld [vmem:[%s749_s1 + $0xf8] sm:$0xff]   ;;  %485 = vmatprep.subr.bf16.mxu0 %v541_v0  ;;  %v546_v5 = vld [vmem:[%s749_s1 + $0xf0] sm:$0xff]   ;;  %v550_v9 = vld [vmem:[%s749_s1 + $0xe8] sm:$0xff]  }
   0x3   :  { %v543_v2 = vld [vmem:[%s749_s1 + $0x38] sm:$0xff]   ;;  %513 = vmatprep.subr.bf16.mxu1 %v542_v1  ;;  %v547_v6 = vld [vmem:[%s749_s1 + $0x30] sm:$0xff]   ;;  %v551_v10 = vld [vmem:[%s749_s1 + $0x28] sm:$0xff]  }
   0x4   :  { %v544_v3 = vld [vmem:[%s749_s1 + $0xb8] sm:$0xff]   ;;  %486 = vmatpush3.bf16.msra.mxu0 %v543_v2  ;;  %v548_v7 = vld [vmem:[%s749_s1 + $0xb0] sm:$0xff]   ;;  %v552_v11 = vld [vmem:[%s749_s1 + $0xa8] sm:$0xff]  }
   0x5   :  { %514 = vmatpush3.bf16.msra.mxu1 %v544_v3  ;;  %487 = vmatprep.subr.bf16.mxu0 %v545_v4  ;;  %v553_v12 = vld [vmem:[%s749_s1 + $0x60] sm:$0xff]   ;;  %v557_v16 = vld [vmem:[%s749_s1 + $0x58] sm:$0xff]   ;;  %v561_v20 = vld [vmem:[%s749_s1 + $0x50] sm:$0xff]  }
   0x6   :  { %515 = vmatprep.subr.bf16.mxu1 %v546_v5  ;;  %v554_v13 = vld [vmem:[%s749_s1 + $0xe0] sm:$0xff]   ;;  %v558_v17 = vld [vmem:[%s749_s1 + $0xd8] sm:$0xff]   ;;  %v562_v21 = vld [vmem:[%s749_s1 + $0xd0] sm:$0xff]  }
   0x7   :  { %v555_v14 = vld [vmem:[%s749_s1 + $0x20] sm:$0xff]   ;;  %v559_v18 = vld [vmem:[%s749_s1 + $0x18] sm:$0xff]   ;;  %v563_v22 = vld [vmem:[%s749_s1 + $0x10] sm:$0xff]  }
   0x8   :  { %488 = vmatpush3.bf16.msra.mxu0 %v547_v6  ;;  %v556_v15 = vld [vmem:[%s749_s1 + $0xa0] sm:$0xff]   ;;  %v560_v19 = vld [vmem:[%s749_s1 + $0x98] sm:$0xff]   ;;  %v564_v23 = vld [vmem:[%s749_s1 + $0x90] sm:$0xff]  }
   0x9   :  { %516 = vmatpush3.bf16.msra.mxu1 %v548_v7  ;;  %489 = vmatprep.subr.bf16.mxu0 %v549_v8  ;;  %v565_v24 = vld [vmem:[%s749_s1 + $0x48] sm:$0xff]   ;;  %v569_v28 = vld [vmem:[%s749_s1 + $0x40] sm:$0xff]   ;;  %v21_v1 = vld [vmem:[%s751_s2 + $0x10] sm:$0xff] }
   0xa   :  { %517 = vmatprep.subr.bf16.mxu1 %v550_v9  ;;  %v566_v25 = vld [vmem:[%s749_s1 + $0xc8] sm:$0xff]   ;;  %v570_v29 = vld [vmem:[%s749_s1 + $0xc0] sm:$0xff]   ;;  %v22_v9 = vld [vmem:[%s751_s2 + $0x18] sm:$0xff] }
   0xb   :  { %v567_v26 = vld [vmem:[%s749_s1 + $0x8] sm:$0xff]   ;;  %v571_v30 = vld [vmem:[%s749_s1] sm:$0xff]  }
   0xc   :  { %490 = vmatpush3.bf16.msra.mxu0 %v551_v10  ;;  %v568_v27 = vld [vmem:[%s749_s1 + $0x88] sm:$0xff]   ;;  %v572_v31 = vld [vmem:[%s749_s1 + $0x80] sm:$0xff]  }
   0xd   :  { %518 = vmatpush3.bf16.msra.mxu1 %v552_v11  ;;  %491 = vmatprep.subr.bf16.mxu0 %v553_v12  ;;  %v573_v32 = vld [vmem:[%s750_s0] ss:$16 sps:$4 sm:$0xff]   ;;  %v575_v33 = vld [vmem:[%s750_s0 + $0x4] ss:$16 sps:$4 sm:$0xff]   ;;  %v576_v34 = vld [vmem:[%s750_s0 + $0x8] ss:$16 sps:$4 sm:$0xff]  }
   0xe   :  { %519 = vmatprep.subr.bf16.mxu1 %v554_v13  ;;  %v578_v35 = vld [vmem:[%s750_s0 + $0xc] ss:$16 sps:$4 sm:$0xff]   ;;  %367 = vmatprep.mubr.bf16.mxu0 %v575_v33  ;;  %v579_v36 = vld [vmem:[%s750_s0 + $0x24] ss:$16 sps:$4 sm:$0xff]   ;;  %v583_v38 = vld [vmem:[%s750_s0 + $0x20] ss:$16 sps:$4 sm:$0xff]  }
   0xf   :  { %416 = vmatprep.mubr.bf16.mxu1 %v578_v35  ;;  %v581_v37 = vld [vmem:[%s750_s0 + $0x2c] ss:$16 sps:$4 sm:$0xff]   ;;  %v584_v39 = vld [vmem:[%s750_s0 + $0x28] ss:$16 sps:$4 sm:$0xff]   ;;  %v19_v47 = vld [vmem:[%s751_s2] sm:$0xff] }
  0x10   :  { %492 = vmatpush3.bf16.msra.mxu0 %v555_v14  ;;  %v20_v56 = vld [vmem:[%s751_s2 + $0x8] sm:$0xff] }
  0x11   :  { %520 = vmatpush3.bf16.msra.mxu1 %v556_v15  ;;  %493 = vmatprep.subr.bf16.mxu0 %v557_v16 }
  0x12   :  { %521 = vmatprep.subr.bf16.mxu1 %v558_v17 }
  0x14   :  { %494 = vmatpush3.bf16.msra.mxu0 %v559_v18 }
  0x15   :  { %522 = vmatpush3.bf16.msra.mxu1 %v560_v19  ;;  %495 = vmatprep.subr.bf16.mxu0 %v561_v20 }
  0x16   :  { %523 = vmatprep.subr.bf16.mxu1 %v562_v21 }
  0x18   :  { %496 = vmatpush3.bf16.msra.mxu0 %v563_v22 }
  0x19   :  { %524 = vmatpush3.bf16.msra.mxu1 %v564_v23  ;;  %497 = vmatprep.subr.bf16.mxu0 %v565_v24 }
  0x1a   :  { %525 = vmatprep.subr.bf16.mxu1 %v566_v25 }
  0x1c   :  { %498 = vmatpush3.bf16.msra.mxu0 %v567_v26 }
  0x1d   :  { %526 = vmatpush3.bf16.msra.mxu1 %v568_v27  ;;  %499 = vmatprep.subr.bf16.mxu0 %v569_v28 }
  0x1e   :  { %527 = vmatprep.subr.bf16.mxu1 %v570_v29 }
  0x20   :  { %500 = vmatpush3.bf16.msra.mxu0 %v571_v30 }
  0x21   :  { %528 = vmatpush3.bf16.msra.mxu1 %v572_v31 }
  0x23   :  { %368 = vmatmul.mubr.bf16.vlgmr.msra.gmra.mxu0 %v573_v32 }
  0x24   :  { %417 = vmatmul.mubr.bf16.vlgmr.msra.gmra.mxu1 %v576_v34  ;;  %375 = vmatprep.mubr.bf16.mxu0 %v579_v36 }
  0x25   :  { %424 = vmatprep.mubr.bf16.mxu1 %v581_v37 }
  0x2b   :  { %376 = vmatmul.mubr.bf16.gmra.mxu0 %v583_v38 }
  0x2c   :  { %425 = vmatmul.mubr.bf16.gmra.mxu1 %v584_v39 }
  0xe3   :  { %v501_v40 = vpop.f32.mrf.mxu0 }
  0xe4   :  { %v529_v41 = vpop.f32.mrf.mxu1 }
  0xe5   :  { %v502_v42 = vpop.f32.mrf.mxu0 }
  0xe6   :  { %v503_v43 = vadd.f32 %v502_v42, %v501_v40  ;;  %v530_v44 = vpop.f32.mrf.mxu1 }
  0xe7   :  { %v531_v45 = vadd.f32 %v530_v44, %v529_v41  ;;  %v504_v46 = vpop.f32.mrf.mxu0 }
  0xe8   :  { %v532_v48 = vpop.f32.mrf.mxu1 }
  0xe9   :  { %v419_v49 = vadd.f32 %v531_v45, %v503_v43  ;;  %v505_v50 = vpop.f32.mrf.mxu0 }
  0xea   :  { %v506_v51 = vadd.f32 %v505_v50, %v504_v46  ;;  %v533_v52 = vpop.f32.mrf.mxu1 }
  0xeb   :  { %v433_v53 = vadd.f32 %v419_v49, %v19_v47  ;;  %v534_v54 = vadd.f32 %v533_v52, %v532_v48  ;;  %v507_v55 = vpop.f32.mrf.mxu0 }
  0xec   :  { %v535_v57 = vpop.f32.mrf.mxu1 }
  0xed   :  { %437 = vst [vmem:[%s752_s3] sm:$0xff] %v433_v53  ;;  %v422_v58 = vadd.f32 %v534_v54, %v506_v51  ;;  %v508_v59 = vpop.f32.mrf.mxu0 }
  0xee   :  { %v509_v60 = vadd.f32 %v508_v59, %v507_v55  ;;  %v536_v61 = vpop.f32.mrf.mxu1 }
  0xef   :  { %v434_v62 = vadd.f32 %v422_v58, %v20_v56  ;;  %v537_v63 = vadd.f32 %v536_v61, %v535_v57  ;;  %v510_v0 = vpop.f32.mrf.mxu0 }
  0xf0   :  { %v538_v2 = vpop.f32.mrf.mxu1 }
  0xf1   :  { %438 = vst [vmem:[%s752_s3 + $0x8] sm:$0xff] %v434_v62  ;;  %v427_v3 = vadd.f32 %v537_v63, %v509_v60  ;;  %v511_v4 = vpop.f32.mrf.mxu0 }
  0xf2   :  { %v512_v5 = vadd.f32 %v511_v4, %v510_v0  ;;  %v539_v6 = vpop.f32.mrf.mxu1 }
  0xf3   :  { %v435_v7 = vadd.f32 %v427_v3, %v21_v1  ;;  %v540_v8 = vadd.f32 %v539_v6, %v538_v2 }
  0xf5   :  { %439 = vst [vmem:[%s752_s3 + $0x10] sm:$0xff] %v435_v7  ;;  %v430_v10 = vadd.f32 %v540_v8, %v512_v5 }
  0xf7   :  { %v436_v11 = vadd.f32 %v430_v10, %v22_v9 }
  0xf9   :  { %440 = vst [vmem:[%s752_s3 + $0x18] sm:$0xff] %v436_v11 }

</bundles_post_ra>
